<compile_context>
chip_gen: v6e
topology: v6e:2x2x1
jax: 0.10.0
libtpu: 0.0.40
codegen_flags: <defaults>
</compile_context>

<pallas_src>
import jax
import jax.numpy as jnp
from jax.experimental import pallas as pl
from jax.experimental.pallas import tpu as pltpu

_LANE_CHOICES = (512, 256, 128)   # lane-dense widths (multiples of 128), tried in order
_MIN_TILE_BYTES = 256 * 1024      # never shrink tiles below ~256 KiB
_SMALL_BYTES = 1 * 1024 * 1024    # below this: single block (per-step overhead dominates)
_MIN_GRID_STEPS = 8               # aim for >= 8 steps so in/out DMA overlaps + v7x TC sharding


def _scale_kernel(scale_ref, x_ref, o_ref):
    # scale_ref: (1,) f32 in SMEM.  Multiply (may promote to f32) and cast back so the
    # store stays in the output dtype (packed, lane-dense) even for bf16 inputs.
    o_ref[...] = (x_ref[...] * scale_ref[0]).astype(o_ref.dtype)
    # TODO(synk): Grad_damp only scales the gradient in backward (grad * 1e-5);
    # its forward is an identity, so there is nothing else to compute here.


def _tile_budget_and_vmem_limit():
    """Per-generation tile budget: 4 MiB tiles on v7x (explicit VMEM limit so the
    2-in + 2-out double buffers fit comfortably), 2 MiB tiles elsewhere."""
    try:
        kind = jax.devices()[0].device_kind.lower()
    except Exception:
        kind = ""
    if "v7" in kind:
        return 4 * 1024 * 1024, 24 * 1024 * 1024
    return 2 * 1024 * 1024, None


def _pick_row_tile(rows, lanes, itemsize, max_tile_bytes):
    total_bytes = rows * lanes * itemsize
    if total_bytes <= _SMALL_BYTES:
        return rows                                # single block == full array dims (legal)
    bytes_per_row = lanes * itemsize
    max_rows = max(8, (max_tile_bytes // bytes_per_row) // 8 * 8)
    min_rows = max(8, (_MIN_TILE_BYTES // bytes_per_row) // 8 * 8)
    target = -(-rows // _MIN_GRID_STEPS)           # cdiv: rows per step for >= MIN steps
    target = ((target + 7) // 8) * 8               # multiple of 8 (sublane constraint)
    row_tile = max(min_rows, min(target, max_rows))
    return min(row_tile, rows)


def _scale_2d(x2d, scale_f32, row_tile, vmem_limit_bytes):
    rows, lanes = x2d.shape
    grid = (pl.cdiv(rows, row_tile),)
    params = dict(dimension_semantics=("parallel",))  # shards grid across v7x's 2 TCs
    if vmem_limit_bytes is not None:
        params["vmem_limit_bytes"] = vmem_limit_bytes
    return pl.pallas_call(
        _scale_kernel,
        out_shape=jax.ShapeDtypeStruct((rows, lanes), x2d.dtype),
        grid=grid,
        in_specs=[
            pl.BlockSpec(memory_space=pltpu.SMEM),               # scalar `scale` (f32)
            pl.BlockSpec((row_tile, lanes), lambda i: (i, 0)),   # lane-dense x tile
        ],
        out_specs=pl.BlockSpec((row_tile, lanes), lambda i: (i, 0)),
        compiler_params=pltpu.CompilerParams(**params),
    )(scale_f32, x2d)


def scale_layer(x: jnp.ndarray, scale: jnp.ndarray) -> jnp.ndarray:
    """out = x * scale (ScaleLayer forward; Grad_damp forward is identity).

    x: any-shape float array (module uses NCHW).
    scale: single-element float array (the module's learnable parameter).

    Note: ideally this scalar multiply would be fused into its producer/consumer
    rather than paying its own HBM round-trip; as a standalone kernel we make
    that round-trip as efficient as possible.
    """
    orig_shape = x.shape
    total = x.size
    scale_f32 = jnp.asarray(scale, dtype=jnp.float32).reshape((1,))

    if total == 0:
        return x

    max_tile_bytes, vmem_limit = _tile_budget_and_vmem_limit()
    itemsize = jnp.dtype(x.dtype).itemsize

    # Preferred path: a lane width that divides the element count exactly -> no
    # pad/slice HBM round-trips at all, just a (free) contiguous reshape.
    lanes = next((l for l in _LANE_CHOICES if total % l == 0), None)
    if lanes is not None:
        rows = total // lanes
        x2d = x.reshape(rows, lanes)
        row_tile = _pick_row_tile(rows, lanes, itemsize, max_tile_bytes)
        out2d = _scale_2d(x2d, scale_f32, row_tile, vmem_limit)
        return out2d.reshape(orig_shape)

    # Awkward element count: kernel on the lane-aligned prefix, tiny XLA multiply
    # for the (<512-element) tail.  Avoids padding + slicing whole-tensor passes.
    lanes = _LANE_CHOICES[0]
    flat = x.reshape(-1)
    main = (total // lanes) * lanes
    out_tail = (flat[main:] * scale_f32[0]).astype(x.dtype)
    if main == 0:
        return out_tail.reshape(orig_shape)
    rows = main // lanes
    x2d = flat[:main].reshape(rows, lanes)
    row_tile = _pick_row_tile(rows, lanes, itemsize, max_tile_bytes)
    out_main = _scale_2d(x2d, scale_f32, row_tile, vmem_limit).reshape(-1)
    return jnp.concatenate([out_main, out_tail]).reshape(orig_shape)


if __name__ == "__main__":
    key = jax.random.PRNGKey(0)

    # Deterministic parameter init, exactly as in the module: init_value=0.001.
    scale = jnp.array([0.001], dtype=jnp.float32)

    # 1) Small NCHW feature map (divisible-by-512 path, single block).
    x = jax.random.normal(key, (2, 4, 16, 16), dtype=jnp.float32)
    out = jax.block_until_ready(scale_layer(x, scale))
    ref = x * scale
    assert out.shape == x.shape and out.dtype == x.dtype
    assert jnp.allclose(out, ref, atol=0.0, rtol=1e-6)

    # 2) Awkward element count (945 elements): prefix kernel + XLA tail, no pad/slice.
    x_odd = jax.random.normal(jax.random.PRNGKey(1), (3, 5, 7, 9), dtype=jnp.float32)
    out_odd = jax.block_until_ready(scale_layer(x_odd, scale))
    ref_odd = x_odd * scale
    assert out_odd.shape == x_odd.shape
    assert jnp.allclose(out_odd, ref_odd, atol=0.0, rtol=1e-6)

    # 3) bf16 input: exercises the in-kernel .astype(o_ref.dtype) store path.
    x_bf16 = jax.random.normal(jax.random.PRNGKey(2), (2, 4, 16, 16), dtype=jnp.bfloat16)
    out_bf16 = jax.block_until_ready(scale_layer(x_bf16, scale))
    ref_bf16 = (x_bf16 * scale[0]).astype(jnp.bfloat16)
    assert out_bf16.shape == x_bf16.shape and out_bf16.dtype == jnp.bfloat16
    assert jnp.allclose(out_bf16.astype(jnp.float32), ref_bf16.astype(jnp.float32),
                        atol=0.0, rtol=1e-2)

    print("KERNEL_OK")
</pallas_src>

<mosaic_0001>
module attributes {stable_mosaic.version = 11 : i64} {
  func.func @_scale_kernel(%arg0: i32, %arg1: memref<1xf32, #tpu.memory_space<smem>>, %arg2: memref<4x512xf32, #tpu.memory_space<vmem>>, %arg3: memref<4x512xf32, #tpu.memory_space<vmem>>) attributes {dimension_semantics = [#tpu.dimension_semantics<parallel>], iteration_bounds = array<i64: 1>, scalar_prefetch = 0 : i64, scratch_operands = 0 : i64, tpu.core_type = #tpu.core_type<tc>, window_params = [{transform_indices = @transform_0, window_bounds = array<i64: 1>}, {transform_indices = @transform_1, window_bounds = array<i64: 4, 512>}, {transform_indices = @transform_2, window_bounds = array<i64: 4, 512>}]} {
    %c0 = arith.constant 0 : index
    %c0_0 = arith.constant 0 : index
    %0 = vector.load %arg2[%c0, %c0_0] : memref<4x512xf32, #tpu.memory_space<vmem>>, vector<4x512xf32>
    %c0_1 = arith.constant 0 : index
    %1 = memref.load %arg1[%c0_1] : memref<1xf32, #tpu.memory_space<smem>>
    %2 = vector.broadcast %1 : f32 to vector<4x512xf32>
    %3 = arith.mulf %0, %2 : vector<4x512xf32>
    %c0_2 = arith.constant 0 : index
    %c0_3 = arith.constant 0 : index
    %4 = vector.load %arg3[%c0_2, %c0_3] : memref<4x512xf32, #tpu.memory_space<vmem>>, vector<4x512xf32>
    tpu.vector_store %arg3[%c0_2, %c0_3], %3 {strides = array<i32>} : memref<4x512xf32, #tpu.memory_space<vmem>>, vector<4x512xf32>,
    return
  }
  func.func @transform_0(%arg0: i32) -> i32 {
    %c0_i32 = arith.constant 0 : i32
    %c0_i32_0 = arith.constant 0 : i32
    return %c0_i32 : i32
  }
  func.func @transform_1(%arg0: i32) -> (i32, i32) {
    %c0_i32 = arith.constant 0 : i32
    %c0_i32_0 = arith.constant 0 : i32
    return %arg0, %c0_i32 : i32, i32
  }
  func.func @transform_2(%arg0: i32) -> (i32, i32) {
    %c0_i32 = arith.constant 0 : i32
    %c0_i32_0 = arith.constant 0 : i32
    return %arg0, %c0_i32 : i32, i32
  }
}

</mosaic_0001>

<bundles_post_ra>
// kernel: tpu_custom_call.1
= control target key start
LH: loop header
LB: loop body
LE: loop exit
PB: predicated region body
PF: predicated region fallthrough
CT: control target
= control target key end

     0   :  { %8 = vsyncpa [#allocation4], 0  ;;  %s120_s0 = inlined_call_operand.<no memory space> [shape: f32[1], index: 0, kind: input, shape index: {}]   ;;  %s121_s1 = inlined_call_operand.hbm [shape: f32[4,512], index: 1, kind: input, shape index: {}]   ;;  %s122_s2 = inlined_call_operand.hbm [shape: f32[4,512], index: 2, kind: output, shape index: {}]  }
   0x1   :  { %9 = vsyncpa [#allocation5], 0  ;;  %s94_s9 = smov [#allocation3]  }
   0x2   :  { %s18_s10 = sshll.u32 %s94_s9, 4  ;;  %s19_s10 = int_to_ptr.vmem [resolvable:$true] %s18_s10 }
   0x3   :  { %s58_s11 = scalar_lea.vmem %s19_s10, 256  ;;  %p63_p1 = scmp.lt.s32.totalorder %s19_s10, %s19_s10 }
   0x4   :  { %p59_p0 = scmp.ne.s32.totalorder %s19_s10, %s58_s11  ;;  %p64_p2 = scmp.lt.s32.totalorder %s58_s11, %s58_s11 }
   0x6   :  { %p65_p3 = por %p64_p2, %p63_p1 }
   0x8   :  { %p66_p4 = pnand %p65_p3, %p59_p0 }
   0xa   :  { %69 = shalt.err (!%p66_p4)
}
   0xb   :  { %21 = dma.hbm_to_vmem [thread:$0]  %s121_s1, 256, %s19_s10, [#allocation4]  }
   0xc   :  { %90 = dma.done.wait [#allocation4], 256  }
   0xd   :  { %91 = vsyncadd [#allocation4], 4294967040  ;;  %v28_v0 = vstv %s120_s0  ;;  %s95_s16 = smov [#allocation6]   ;;  %v25_v1 = vld [vmem:[#allocation3] sm:$0xff]  ;;  %v26_v2 = vld [vmem:[#allocation3 + $0x8] sm:$0xff] }
   0xe   :  { %s39_s17 = sshll.u32 %s95_s16, 4  ;;  %v29_v3 = vmul.f32 %v28_v0, %v25_v1  ;;  %v30_v4 = vmul.f32 %v28_v0, %v26_v2  ;;  %s40_s17 = int_to_ptr.vmem [resolvable:$true] %s39_s17 }
   0xf   :  { %s70_s18 = scalar_lea.vmem %s40_s17, 256  ;;  %p75_p6 = scmp.lt.s32.totalorder %s40_s17, %s40_s17 }
  0x10   :  { %31 = vst [vmem:[#allocation6] sm:$0xff] %v29_v3  ;;  %32 = vst [vmem:[#allocation6 + $0x8] sm:$0xff] %v30_v4  ;;  %p71_p5 = scmp.ne.s32.totalorder %s40_s17, %s70_s18  ;;  %p76_p7 = scmp.lt.s32.totalorder %s70_s18, %s70_s18 }
  0x12   :  { %p77_p8 = por %p76_p7, %p75_p6 }
  0x14   :  { %p78_p9 = pnand %p77_p8, %p71_p5 }
  0x16   :  { %81 = shalt.err (!%p78_p9)
}
  0x17   :  { %42 = dma.vmem_to_hbm [thread:$0]  %s40_s17, 256, %s122_s2, [#allocation5]  }
  0x18   :  { %92 = dma.done.wait [#allocation5], 256  }
  0x19   :  { %93 = vsyncadd [#allocation5], 4294967040 }
  0x1a   :  { %46 = vsyncpa [#allocation4], 1 }
  0x1b   :  { %47 = vsyncpa [#allocation5], 1 }

</bundles_post_ra>
